<compile_context>
chip_gen: v7x
topology: tpu7x:2x2x1
jax: 0.10.0
libtpu: 0.0.40
codegen_flags: <defaults>
</compile_context>

<pallas_src>
import math

import numpy as np
import jax
import jax.numpy as jnp
from jax import lax
from jax.experimental import pallas as pl
from jax.experimental.pallas import tpu as pltpu


# ----------------------------------------------------------------------------
# Config (mirrors conf.training.heatmap.*)
# ----------------------------------------------------------------------------
SIGMA = 2          # conf.training.heatmap.sigma
NUM_CLASSES = 8    # conf.training.heatmap.num_classes ('ce' criterion)
HEATMAP_RES = 16   # small=False -> 16^3 heatmap
BATCH = 2

# TODO(synk): only the 'ce' criterion branch is implemented as a Pallas kernel;
# the l1/l2/smooth_l1 branches and return_target_volume are plain elementwise
# losses left to XLA.


# ----------------------------------------------------------------------------
# Init-time, host-side parameter construction (deterministic, numpy)
# Mirrors Gaussian.__init__ / PoseHeatMapCriterion.__init__ ('ce' branch).
# ----------------------------------------------------------------------------
def gaussian_1d(sigma: int):
    ksize = max(2 * sigma + 1, 3)
    mean = (ksize - 1) / 2.0
    t = np.arange(ksize, dtype=np.float32)
    k = (1.0 / (sigma * math.sqrt(2.0 * math.pi))) * np.exp(
        -((t - mean) / (2.0 * sigma)) ** 2)
    return k.astype(np.float32), ksize


def conv_matrix(res: int, k1d: np.ndarray) -> np.ndarray:
    """G[o, j] = k1d[j - o + pad]: 'same' cross-correlation w/ zero padding."""
    K = k1d.shape[0]
    pad = (K - 1) // 2
    G = np.zeros((res, res), np.float32)
    for o in range(res):
        for i in range(K):
            j = o + i - pad
            if 0 <= j < res:
                G[o, j] = k1d[i]
    return G


def ce_class_weights(sigma: int, num_classes: int, res: int) -> np.ndarray:
    """Replicates the torch.histc-based class weight init (host side)."""
    k1d, ksize = gaussian_1d(sigma)
    G3 = conv_matrix(3, k1d)
    delta = np.zeros((3, 3, 3), np.float32)
    delta[1, 1, 1] = 1.0
    v = np.einsum('Xx,Yy,Zz,xyz->XYZ', G3, G3, G3, delta)
    v = np.floor(v / v.max() * float(num_classes))
    lo, hi = float(v.min()), float(v.max())
    hist = np.zeros(num_classes, np.float32)
    width = (hi - lo) / num_classes if hi > lo else 1.0
    for val in v.ravel():
        if val < lo or val > hi:
            continue
        b = min(int((val - lo) / width), num_classes - 1)
        hist[b] += 1.0
    hist[0] += res ** 3 - ksize ** 3
    w = np.zeros(num_classes, np.float32)
    for c in range(num_classes):
        if hist[c] > 0:
            w[c] = 1.0 / np.log(1.2 + hist[c])
    return w.astype(np.float32)


# ----------------------------------------------------------------------------
# Pallas kernel
# ----------------------------------------------------------------------------
def _make_pose_heatmap_ce_kernel(k1d_np: np.ndarray, res: int):
    """Build the per-batch kernel body with the Gaussian taps baked in."""
    k1d_np = np.asarray(k1d_np, np.float32)
    K = int(k1d_np.shape[0])
    PAD = (K - 1) // 2
    # Gaussian taps are symmetric bit-for-bit (same float inputs to exp), so
    # selecting on |distance| uses exactly the host-computed constants.
    assert np.array_equal(k1d_np, k1d_np[::-1]), "Gaussian taps must be symmetric"
    sym_taps = [float(k1d_np[PAD + d]) for d in range(PAD + 1)]
    # Global max of the smoothed volume == center coefficient cubed, computed
    # in the same f32 multiply order as the reference (kx*ky)*kz.
    center = np.float32(k1d_np[PAD])
    max_val = np.float32(np.float32(center * center) * center)
    inv_max = float(np.float32(1.0) / max_val)
    assert res & (res - 1) == 0, "heatmap resolution must be a power of two"
    shift = int(res).bit_length() - 1          # hw // res == hw >> shift
    lane_mask = res - 1                        # hw %  res == hw &  mask

    def kernel(skel_ref, w_ref, logits_ref, out_ref):
        # skel_ref  : SMEM (B, 3) f32  -- target skeleton coords (center-shifted)
        # w_ref     : SMEM (C,)  f32   -- CE class weights
        # logits_ref: VMEM (1, C, R, R*R) f32  -- one batch block, lane-dense
        # out_ref   : VMEM (1, 1, 1) f32 -- per-batch weighted-CE sum
        b = pl.program_id(0)
        _, C, R, RR = logits_ref.shape

        # Hoisted SMEM scalar reads (JAX will not CSE re-reads inside loops).
        sx = skel_ref[b, 0]
        sy = skel_ref[b, 1]
        sz = skel_ref[b, 2]
        w_sc = [w_ref[c] for c in range(C)]

        # Spatial index fields (4 f32 vregs each); hw_io dies after y/z derive.
        x_io = lax.broadcasted_iota(jnp.int32, (R, RR), 0).astype(jnp.float32)
        hw_io = lax.broadcasted_iota(jnp.int32, (R, RR), 1)
        y_io = (hw_io >> shift).astype(jnp.float32)
        z_io = (hw_io & lane_mask).astype(jnp.float32)
        zeros = jnp.zeros((R, RR), jnp.float32)

        def peak_vec(s):
            # quantized target voxel index along one axis, broadcast to the tile
            v = zeros + s
            return jnp.clip(jnp.floor((v + 1.0) * (0.5 * R)), 0.0, float(R - 1))

        def axis_factor(io, pv):
            # 1-D Gaussian response to a delta at pv; symmetric-tap selection.
            a = jnp.abs(pv - io)
            f = zeros
            for d in range(PAD + 1):
                f = jnp.where(a == float(d), jnp.float32(sym_taps[d]), f)
            return f

        # --- analytic smoothed target + class quantization (VPU only) --------
        fx = axis_factor(x_io, peak_vec(sx))
        fy = axis_factor(y_io, peak_vec(sy))
        fz = axis_factor(z_io, peak_vec(sz))
        tv = (fx * fy) * fz * inv_max          # normalized target volume
        tgt = jnp.clip(jnp.floor(tv * float(C)), 0.0, float(C - 1))

        # --- weighted per-voxel cross entropy, 2-pass over classes -----------
        m = logits_ref[0, 0]
        for c in range(1, C):
            m = jnp.maximum(m, logits_ref[0, c])

        ssum = zeros
        picked = zeros
        wmap = zeros
        for c in range(C):
            x = logits_ref[0, c]
            ssum = ssum + jnp.exp(x - m)       # exp -> EUP slot
            msk = tgt == float(c)
            picked = jnp.where(msk, x, picked)
            wmap = jnp.where(msk, w_sc[c], wmap)

        lse = m + jnp.log(ssum)                # logsumexp over classes
        acc = wmap * (lse - picked)

        batch_sum = jnp.sum(acc, axis=(0, 1), keepdims=True)   # (1, 1)
        out_ref[...] = batch_sum.reshape(1, 1, 1)

    return kernel


def pose_heatmap_criterion_ce(predicted_volume, target_skeleton, class_weights,
                              k1d, volume_center=None):
    B, C, R = (predicted_volume.shape[0], predicted_volume.shape[1],
               predicted_volume.shape[2])
    RR = R * R
    skel = target_skeleton.astype(jnp.float32)
    if volume_center is not None:
        skel = skel - volume_center
    # Free contiguous reshape: NCDHW -> (B, C, D, H*W), lane-dense last dim.
    # (Producer is natively f32 -- no wrapper-side dtype cast added.)
    logits = predicted_volume.reshape(B, C, R, RR).astype(jnp.float32)

    kernel = _make_pose_heatmap_ce_kernel(np.asarray(k1d, np.float32), R)
    partial = pl.pallas_call(
        kernel,
        grid=(B,),
        in_specs=[
            pl.BlockSpec(memory_space=pltpu.MemorySpace.SMEM),    # skeleton (B, 3)
            pl.BlockSpec(memory_space=pltpu.MemorySpace.SMEM),    # class weights (C,)
            pl.BlockSpec((1, C, R, RR), lambda b: (b, 0, 0, 0)),  # per-batch logits
        ],
        out_specs=pl.BlockSpec((1, 1, 1), lambda b: (b, 0, 0)),   # per-batch sum
        out_shape=jax.ShapeDtypeStruct((B, 1, 1), jnp.float32),
        compiler_params=pltpu.CompilerParams(dimension_semantics=("parallel",)),
    )(skel, class_weights, logits)
    # Finish the mean over all B * R^3 voxels in the wrapper.
    return jnp.sum(partial) * (1.0 / float(B * R * R * R))


# ----------------------------------------------------------------------------
# Pure numpy reference (full 3-D conv, independent of the kernel's math)
# ----------------------------------------------------------------------------
def reference_loss_np(pred, skel, sigma, num_classes, res, weights):
    pred = np.asarray(pred, np.float32)
    skel = np.asarray(skel, np.float32)
    B = skel.shape[0]
    k1d, K = gaussian_1d(sigma)
    k3d = k1d[:, None, None] * k1d[None, :, None] * k1d[None, None, :]
    p = (K - 1) // 2
    idx = np.clip(np.floor((skel + 1.0) * res / 2.0), 0, res - 1).astype(np.int64)
    tv = np.zeros((B, res, res, res), np.float32)
    for b in range(B):
        tv[b, idx[b, 0], idx[b, 1], idx[b, 2]] = 1.0
    padded = np.pad(tv, ((0, 0), (p, p), (p, p), (p, p)))
    sm = np.zeros_like(tv)
    for b in range(B):
        for x in range(res):
            for y in range(res):
                for z in range(res):
                    sm[b, x, y, z] = np.sum(
                        padded[b, x:x + K, y:y + K, z:z + K] * k3d)
    sm = sm / sm.max()
    tgt = np.clip(np.floor(sm * num_classes).astype(np.int64), 0, num_classes - 1)
    logits = np.transpose(pred, (0, 2, 3, 4, 1)).reshape(-1, num_classes)
    t = tgt.reshape(-1)
    m = logits.max(axis=1)
    lse = m + np.log(np.exp(logits - m[:, None]).sum(axis=1))
    picked = logits[np.arange(logits.shape[0]), t]
    loss = weights[t] * (lse - picked)
    return np.float32(loss.mean())


if __name__ == "__main__":
    key = jax.random.PRNGKey(0)
    k1, k2 = jax.random.split(key)
    predicted_volume = jax.random.normal(
        k1, (BATCH, NUM_CLASSES, HEATMAP_RES, HEATMAP_RES, HEATMAP_RES),
        jnp.float32)
    target_skeleton = jax.random.uniform(
        k2, (BATCH, 3), jnp.float32, minval=-0.9, maxval=0.9)

    k1d, _ = gaussian_1d(SIGMA)
    weights = jnp.asarray(ce_class_weights(SIGMA, NUM_CLASSES, HEATMAP_RES))

    loss = pose_heatmap_criterion_ce(predicted_volume, target_skeleton,
                                     weights, k1d)
    loss = jax.block_until_ready(loss)

    ref = reference_loss_np(np.asarray(predicted_volume),
                            np.asarray(target_skeleton),
                            SIGMA, NUM_CLASSES, HEATMAP_RES,
                            np.asarray(weights))
    np.testing.assert_allclose(float(loss), float(ref), rtol=1e-2, atol=1e-5)
    print("KERNEL_OK")
</pallas_src>

<mosaic_0001>
module attributes {stable_mosaic.version = 11 : i64} {
  func.func @kernel(%arg0: i32, %arg1: memref<2x3xf32, #tpu.memory_space<smem>>, %arg2: memref<8xf32, #tpu.memory_space<smem>>, %arg3: memref<1x8x16x256xf32, #tpu.memory_space<vmem>>, %arg4: memref<1x1x1xf32, #tpu.memory_space<vmem>>) attributes {dimension_semantics = [#tpu.dimension_semantics<parallel>], iteration_bounds = array<i64: 2>, scalar_prefetch = 0 : i64, scratch_operands = 0 : i64, tpu.core_type = #tpu.core_type<tc>, window_params = [{transform_indices = @transform_0, window_bounds = array<i64: 2, 3>}, {transform_indices = @transform_1, window_bounds = array<i64: 8>}, {transform_indices = @transform_2, window_bounds = array<i64: 1, 8, 16, 256>}, {transform_indices = @transform_3, window_bounds = array<i64: 1, 1, 1>}]} {
    %0 = arith.index_cast %arg0 : i32 to index
    %c0 = arith.constant 0 : index
    %1 = memref.load %arg1[%0, %c0] : memref<2x3xf32, #tpu.memory_space<smem>>
    %2 = arith.index_cast %arg0 : i32 to index
    %c1 = arith.constant 1 : index
    %3 = memref.load %arg1[%2, %c1] : memref<2x3xf32, #tpu.memory_space<smem>>
    %4 = arith.index_cast %arg0 : i32 to index
    %c2 = arith.constant 2 : index
    %5 = memref.load %arg1[%4, %c2] : memref<2x3xf32, #tpu.memory_space<smem>>
    %c0_0 = arith.constant 0 : index
    %6 = memref.load %arg2[%c0_0] : memref<8xf32, #tpu.memory_space<smem>>
    %c1_1 = arith.constant 1 : index
    %7 = memref.load %arg2[%c1_1] : memref<8xf32, #tpu.memory_space<smem>>
    %c2_2 = arith.constant 2 : index
    %8 = memref.load %arg2[%c2_2] : memref<8xf32, #tpu.memory_space<smem>>
    %c3 = arith.constant 3 : index
    %9 = memref.load %arg2[%c3] : memref<8xf32, #tpu.memory_space<smem>>
    %c4 = arith.constant 4 : index
    %10 = memref.load %arg2[%c4] : memref<8xf32, #tpu.memory_space<smem>>
    %c5 = arith.constant 5 : index
    %11 = memref.load %arg2[%c5] : memref<8xf32, #tpu.memory_space<smem>>
    %c6 = arith.constant 6 : index
    %12 = memref.load %arg2[%c6] : memref<8xf32, #tpu.memory_space<smem>>
    %c7 = arith.constant 7 : index
    %13 = memref.load %arg2[%c7] : memref<8xf32, #tpu.memory_space<smem>>
    %14 = tpu.iota {dimensions = array<i32: 0>} : vector<16x256xi32>
    %15 = arith.sitofp %14 : vector<16x256xi32> to vector<16x256xf32>
    %16 = tpu.iota {dimensions = array<i32: 1>} : vector<16x256xi32>
    %c4_i32 = arith.constant 4 : i32
    %17 = vector.broadcast %c4_i32 : i32 to vector<16x256xi32>
    %18 = arith.shrsi %16, %17 : vector<16x256xi32>
    %19 = arith.sitofp %18 : vector<16x256xi32> to vector<16x256xf32>
    %c15_i32 = arith.constant 15 : i32
    %20 = vector.broadcast %c15_i32 : i32 to vector<16x256xi32>
    %21 = arith.andi %16, %20 : vector<16x256xi32>
    %22 = arith.sitofp %21 : vector<16x256xi32> to vector<16x256xf32>
    %cst = arith.constant 0.000000e+00 : f32
    %23 = vector.broadcast %cst : f32 to vector<16x256xf32>
    %24 = vector.broadcast %1 : f32 to vector<16x256xf32>
    %25 = arith.addf %23, %24 : vector<16x256xf32>
    %cst_3 = arith.constant 1.000000e+00 : f32
    %26 = vector.broadcast %cst_3 : f32 to vector<16x256xf32>
    %27 = arith.addf %25, %26 : vector<16x256xf32>
    %cst_4 = arith.constant 8.000000e+00 : f32
    %28 = vector.broadcast %cst_4 : f32 to vector<16x256xf32>
    %29 = arith.mulf %27, %28 : vector<16x256xf32>
    %30 = math.floor %29 : vector<16x256xf32>
    %cst_5 = arith.constant 0.000000e+00 : f32
    %cst_6 = arith.constant 1.500000e+01 : f32
    %31 = vector.broadcast %cst_5 : f32 to vector<16x256xf32>
    %32 = arith.maximumf %31, %30 : vector<16x256xf32>
    %33 = vector.broadcast %cst_6 : f32 to vector<16x256xf32>
    %34 = arith.minimumf %33, %32 : vector<16x256xf32>
    %35 = arith.subf %34, %15 : vector<16x256xf32>
    %36 = math.absf %35 : vector<16x256xf32>
    %cst_7 = arith.constant 0.000000e+00 : f32
    %37 = vector.broadcast %cst_7 : f32 to vector<16x256xf32>
    %38 = arith.cmpf oeq, %36, %37 : vector<16x256xf32>
    %cst_8 = arith.constant 0.199471146 : f32
    %39 = vector.broadcast %cst_8 : f32 to vector<16x256xf32>
    %40 = arith.select %38, %39, %23 : vector<16x256xi1>, vector<16x256xf32>
    %cst_9 = arith.constant 1.000000e+00 : f32
    %41 = vector.broadcast %cst_9 : f32 to vector<16x256xf32>
    %42 = arith.cmpf oeq, %36, %41 : vector<16x256xf32>
    %cst_10 = arith.constant 0.187385798 : f32
    %43 = vector.broadcast %cst_10 : f32 to vector<16x256xf32>
    %44 = arith.select %42, %43, %40 : vector<16x256xi1>, vector<16x256xf32>
    %cst_11 = arith.constant 2.000000e+00 : f32
    %45 = vector.broadcast %cst_11 : f32 to vector<16x256xf32>
    %46 = arith.cmpf oeq, %36, %45 : vector<16x256xf32>
    %cst_12 = arith.constant 0.155348271 : f32
    %47 = vector.broadcast %cst_12 : f32 to vector<16x256xf32>
    %48 = arith.select %46, %47, %44 : vector<16x256xi1>, vector<16x256xf32>
    %49 = vector.broadcast %3 : f32 to vector<16x256xf32>
    %50 = arith.addf %23, %49 : vector<16x256xf32>
    %cst_13 = arith.constant 1.000000e+00 : f32
    %51 = vector.broadcast %cst_13 : f32 to vector<16x256xf32>
    %52 = arith.addf %50, %51 : vector<16x256xf32>
    %cst_14 = arith.constant 8.000000e+00 : f32
    %53 = vector.broadcast %cst_14 : f32 to vector<16x256xf32>
    %54 = arith.mulf %52, %53 : vector<16x256xf32>
    %55 = math.floor %54 : vector<16x256xf32>
    %cst_15 = arith.constant 0.000000e+00 : f32
    %cst_16 = arith.constant 1.500000e+01 : f32
    %56 = vector.broadcast %cst_15 : f32 to vector<16x256xf32>
    %57 = arith.maximumf %56, %55 : vector<16x256xf32>
    %58 = vector.broadcast %cst_16 : f32 to vector<16x256xf32>
    %59 = arith.minimumf %58, %57 : vector<16x256xf32>
    %60 = arith.subf %59, %19 : vector<16x256xf32>
    %61 = math.absf %60 : vector<16x256xf32>
    %cst_17 = arith.constant 0.000000e+00 : f32
    %62 = vector.broadcast %cst_17 : f32 to vector<16x256xf32>
    %63 = arith.cmpf oeq, %61, %62 : vector<16x256xf32>
    %cst_18 = arith.constant 0.199471146 : f32
    %64 = vector.broadcast %cst_18 : f32 to vector<16x256xf32>
    %65 = arith.select %63, %64, %23 : vector<16x256xi1>, vector<16x256xf32>
    %cst_19 = arith.constant 1.000000e+00 : f32
    %66 = vector.broadcast %cst_19 : f32 to vector<16x256xf32>
    %67 = arith.cmpf oeq, %61, %66 : vector<16x256xf32>
    %cst_20 = arith.constant 0.187385798 : f32
    %68 = vector.broadcast %cst_20 : f32 to vector<16x256xf32>
    %69 = arith.select %67, %68, %65 : vector<16x256xi1>, vector<16x256xf32>
    %cst_21 = arith.constant 2.000000e+00 : f32
    %70 = vector.broadcast %cst_21 : f32 to vector<16x256xf32>
    %71 = arith.cmpf oeq, %61, %70 : vector<16x256xf32>
    %cst_22 = arith.constant 0.155348271 : f32
    %72 = vector.broadcast %cst_22 : f32 to vector<16x256xf32>
    %73 = arith.select %71, %72, %69 : vector<16x256xi1>, vector<16x256xf32>
    %74 = vector.broadcast %5 : f32 to vector<16x256xf32>
    %75 = arith.addf %23, %74 : vector<16x256xf32>
    %cst_23 = arith.constant 1.000000e+00 : f32
    %76 = vector.broadcast %cst_23 : f32 to vector<16x256xf32>
    %77 = arith.addf %75, %76 : vector<16x256xf32>
    %cst_24 = arith.constant 8.000000e+00 : f32
    %78 = vector.broadcast %cst_24 : f32 to vector<16x256xf32>
    %79 = arith.mulf %77, %78 : vector<16x256xf32>
    %80 = math.floor %79 : vector<16x256xf32>
    %cst_25 = arith.constant 0.000000e+00 : f32
    %cst_26 = arith.constant 1.500000e+01 : f32
    %81 = vector.broadcast %cst_25 : f32 to vector<16x256xf32>
    %82 = arith.maximumf %81, %80 : vector<16x256xf32>
    %83 = vector.broadcast %cst_26 : f32 to vector<16x256xf32>
    %84 = arith.minimumf %83, %82 : vector<16x256xf32>
    %85 = arith.subf %84, %22 : vector<16x256xf32>
    %86 = math.absf %85 : vector<16x256xf32>
    %cst_27 = arith.constant 0.000000e+00 : f32
    %87 = vector.broadcast %cst_27 : f32 to vector<16x256xf32>
    %88 = arith.cmpf oeq, %86, %87 : vector<16x256xf32>
    %cst_28 = arith.constant 0.199471146 : f32
    %89 = vector.broadcast %cst_28 : f32 to vector<16x256xf32>
    %90 = arith.select %88, %89, %23 : vector<16x256xi1>, vector<16x256xf32>
    %cst_29 = arith.constant 1.000000e+00 : f32
    %91 = vector.broadcast %cst_29 : f32 to vector<16x256xf32>
    %92 = arith.cmpf oeq, %86, %91 : vector<16x256xf32>
    %cst_30 = arith.constant 0.187385798 : f32
    %93 = vector.broadcast %cst_30 : f32 to vector<16x256xf32>
    %94 = arith.select %92, %93, %90 : vector<16x256xi1>, vector<16x256xf32>
    %cst_31 = arith.constant 2.000000e+00 : f32
    %95 = vector.broadcast %cst_31 : f32 to vector<16x256xf32>
    %96 = arith.cmpf oeq, %86, %95 : vector<16x256xf32>
    %cst_32 = arith.constant 0.155348271 : f32
    %97 = vector.broadcast %cst_32 : f32 to vector<16x256xf32>
    %98 = arith.select %96, %97, %94 : vector<16x256xi1>, vector<16x256xf32>
    %99 = arith.mulf %48, %73 : vector<16x256xf32>
    %100 = arith.mulf %99, %98 : vector<16x256xf32>
    %cst_33 = arith.constant 125.996872 : f32
    %101 = vector.broadcast %cst_33 : f32 to vector<16x256xf32>
    %102 = arith.mulf %100, %101 : vector<16x256xf32>
    %cst_34 = arith.constant 8.000000e+00 : f32
    %103 = vector.broadcast %cst_34 : f32 to vector<16x256xf32>
    %104 = arith.mulf %102, %103 : vector<16x256xf32>
    %105 = math.floor %104 : vector<16x256xf32>
    %cst_35 = arith.constant 0.000000e+00 : f32
    %cst_36 = arith.constant 7.000000e+00 : f32
    %106 = vector.broadcast %cst_35 : f32 to vector<16x256xf32>
    %107 = arith.maximumf %106, %105 : vector<16x256xf32>
    %108 = vector.broadcast %cst_36 : f32 to vector<16x256xf32>
    %109 = arith.minimumf %108, %107 : vector<16x256xf32>
    %c0_37 = arith.constant 0 : index
    %c0_38 = arith.constant 0 : index
    %c0_39 = arith.constant 0 : index
    %c0_40 = arith.constant 0 : index
    %110 = vector.load %arg3[%c0_37, %c0_38, %c0_39, %c0_40] : memref<1x8x16x256xf32, #tpu.memory_space<vmem>>, vector<1x1x16x256xf32>
    %111 = vector.shape_cast %110 : vector<1x1x16x256xf32> to vector<16x256xf32>
    %c0_41 = arith.constant 0 : index
    %c1_42 = arith.constant 1 : index
    %c0_43 = arith.constant 0 : index
    %c0_44 = arith.constant 0 : index
    %112 = vector.load %arg3[%c0_41, %c1_42, %c0_43, %c0_44] : memref<1x8x16x256xf32, #tpu.memory_space<vmem>>, vector<1x1x16x256xf32>
    %113 = vector.shape_cast %112 : vector<1x1x16x256xf32> to vector<16x256xf32>
    %114 = arith.maximumf %111, %113 : vector<16x256xf32>
    %c0_45 = arith.constant 0 : index
    %c2_46 = arith.constant 2 : index
    %c0_47 = arith.constant 0 : index
    %c0_48 = arith.constant 0 : index
    %115 = vector.load %arg3[%c0_45, %c2_46, %c0_47, %c0_48] : memref<1x8x16x256xf32, #tpu.memory_space<vmem>>, vector<1x1x16x256xf32>
    %116 = vector.shape_cast %115 : vector<1x1x16x256xf32> to vector<16x256xf32>
    %117 = arith.maximumf %114, %116 : vector<16x256xf32>
    %c0_49 = arith.constant 0 : index
    %c3_50 = arith.constant 3 : index
    %c0_51 = arith.constant 0 : index
    %c0_52 = arith.constant 0 : index
    %118 = vector.load %arg3[%c0_49, %c3_50, %c0_51, %c0_52] : memref<1x8x16x256xf32, #tpu.memory_space<vmem>>, vector<1x1x16x256xf32>
    %119 = vector.shape_cast %118 : vector<1x1x16x256xf32> to vector<16x256xf32>
    %120 = arith.maximumf %117, %119 : vector<16x256xf32>
    %c0_53 = arith.constant 0 : index
    %c4_54 = arith.constant 4 : index
    %c0_55 = arith.constant 0 : index
    %c0_56 = arith.constant 0 : index
    %121 = vector.load %arg3[%c0_53, %c4_54, %c0_55, %c0_56] : memref<1x8x16x256xf32, #tpu.memory_space<vmem>>, vector<1x1x16x256xf32>
    %122 = vector.shape_cast %121 : vector<1x1x16x256xf32> to vector<16x256xf32>
    %123 = arith.maximumf %120, %122 : vector<16x256xf32>
    %c0_57 = arith.constant 0 : index
    %c5_58 = arith.constant 5 : index
    %c0_59 = arith.constant 0 : index
    %c0_60 = arith.constant 0 : index
    %124 = vector.load %arg3[%c0_57, %c5_58, %c0_59, %c0_60] : memref<1x8x16x256xf32, #tpu.memory_space<vmem>>, vector<1x1x16x256xf32>
    %125 = vector.shape_cast %124 : vector<1x1x16x256xf32> to vector<16x256xf32>
    %126 = arith.maximumf %123, %125 : vector<16x256xf32>
    %c0_61 = arith.constant 0 : index
    %c6_62 = arith.constant 6 : index
    %c0_63 = arith.constant 0 : index
    %c0_64 = arith.constant 0 : index
    %127 = vector.load %arg3[%c0_61, %c6_62, %c0_63, %c0_64] : memref<1x8x16x256xf32, #tpu.memory_space<vmem>>, vector<1x1x16x256xf32>
    %128 = vector.shape_cast %127 : vector<1x1x16x256xf32> to vector<16x256xf32>
    %129 = arith.maximumf %126, %128 : vector<16x256xf32>
    %c0_65 = arith.constant 0 : index
    %c7_66 = arith.constant 7 : index
    %c0_67 = arith.constant 0 : index
    %c0_68 = arith.constant 0 : index
    %130 = vector.load %arg3[%c0_65, %c7_66, %c0_67, %c0_68] : memref<1x8x16x256xf32, #tpu.memory_space<vmem>>, vector<1x1x16x256xf32>
    %131 = vector.shape_cast %130 : vector<1x1x16x256xf32> to vector<16x256xf32>
    %132 = arith.maximumf %129, %131 : vector<16x256xf32>
    %c0_69 = arith.constant 0 : index
    %c0_70 = arith.constant 0 : index
    %c0_71 = arith.constant 0 : index
    %c0_72 = arith.constant 0 : index
    %133 = vector.load %arg3[%c0_69, %c0_70, %c0_71, %c0_72] : memref<1x8x16x256xf32, #tpu.memory_space<vmem>>, vector<1x1x16x256xf32>
    %134 = vector.shape_cast %133 : vector<1x1x16x256xf32> to vector<16x256xf32>
    %135 = arith.subf %134, %132 : vector<16x256xf32>
    %136 = math.exp %135 : vector<16x256xf32>
    %137 = arith.addf %23, %136 : vector<16x256xf32>
    %cst_73 = arith.constant 0.000000e+00 : f32
    %138 = vector.broadcast %cst_73 : f32 to vector<16x256xf32>
    %139 = arith.cmpf oeq, %109, %138 : vector<16x256xf32>
    %140 = arith.select %139, %134, %23 : vector<16x256xi1>, vector<16x256xf32>
    %141 = vector.broadcast %6 : f32 to vector<16x256xf32>
    %142 = arith.select %139, %141, %23 : vector<16x256xi1>, vector<16x256xf32>
    %c0_74 = arith.constant 0 : index
    %c1_75 = arith.constant 1 : index
    %c0_76 = arith.constant 0 : index
    %c0_77 = arith.constant 0 : index
    %143 = vector.load %arg3[%c0_74, %c1_75, %c0_76, %c0_77] : memref<1x8x16x256xf32, #tpu.memory_space<vmem>>, vector<1x1x16x256xf32>
    %144 = vector.shape_cast %143 : vector<1x1x16x256xf32> to vector<16x256xf32>
    %145 = arith.subf %144, %132 : vector<16x256xf32>
    %146 = math.exp %145 : vector<16x256xf32>
    %147 = arith.addf %137, %146 : vector<16x256xf32>
    %cst_78 = arith.constant 1.000000e+00 : f32
    %148 = vector.broadcast %cst_78 : f32 to vector<16x256xf32>
    %149 = arith.cmpf oeq, %109, %148 : vector<16x256xf32>
    %150 = arith.select %149, %144, %140 : vector<16x256xi1>, vector<16x256xf32>
    %151 = vector.broadcast %7 : f32 to vector<16x256xf32>
    %152 = arith.select %149, %151, %142 : vector<16x256xi1>, vector<16x256xf32>
    %c0_79 = arith.constant 0 : index
    %c2_80 = arith.constant 2 : index
    %c0_81 = arith.constant 0 : index
    %c0_82 = arith.constant 0 : index
    %153 = vector.load %arg3[%c0_79, %c2_80, %c0_81, %c0_82] : memref<1x8x16x256xf32, #tpu.memory_space<vmem>>, vector<1x1x16x256xf32>
    %154 = vector.shape_cast %153 : vector<1x1x16x256xf32> to vector<16x256xf32>
    %155 = arith.subf %154, %132 : vector<16x256xf32>
    %156 = math.exp %155 : vector<16x256xf32>
    %157 = arith.addf %147, %156 : vector<16x256xf32>
    %cst_83 = arith.constant 2.000000e+00 : f32
    %158 = vector.broadcast %cst_83 : f32 to vector<16x256xf32>
    %159 = arith.cmpf oeq, %109, %158 : vector<16x256xf32>
    %160 = arith.select %159, %154, %150 : vector<16x256xi1>, vector<16x256xf32>
    %161 = vector.broadcast %8 : f32 to vector<16x256xf32>
    %162 = arith.select %159, %161, %152 : vector<16x256xi1>, vector<16x256xf32>
    %c0_84 = arith.constant 0 : index
    %c3_85 = arith.constant 3 : index
    %c0_86 = arith.constant 0 : index
    %c0_87 = arith.constant 0 : index
    %163 = vector.load %arg3[%c0_84, %c3_85, %c0_86, %c0_87] : memref<1x8x16x256xf32, #tpu.memory_space<vmem>>, vector<1x1x16x256xf32>
    %164 = vector.shape_cast %163 : vector<1x1x16x256xf32> to vector<16x256xf32>
    %165 = arith.subf %164, %132 : vector<16x256xf32>
    %166 = math.exp %165 : vector<16x256xf32>
    %167 = arith.addf %157, %166 : vector<16x256xf32>
    %cst_88 = arith.constant 3.000000e+00 : f32
    %168 = vector.broadcast %cst_88 : f32 to vector<16x256xf32>
    %169 = arith.cmpf oeq, %109, %168 : vector<16x256xf32>
    %170 = arith.select %169, %164, %160 : vector<16x256xi1>, vector<16x256xf32>
    %171 = vector.broadcast %9 : f32 to vector<16x256xf32>
    %172 = arith.select %169, %171, %162 : vector<16x256xi1>, vector<16x256xf32>
    %c0_89 = arith.constant 0 : index
    %c4_90 = arith.constant 4 : index
    %c0_91 = arith.constant 0 : index
    %c0_92 = arith.constant 0 : index
    %173 = vector.load %arg3[%c0_89, %c4_90, %c0_91, %c0_92] : memref<1x8x16x256xf32, #tpu.memory_space<vmem>>, vector<1x1x16x256xf32>
    %174 = vector.shape_cast %173 : vector<1x1x16x256xf32> to vector<16x256xf32>
    %175 = arith.subf %174, %132 : vector<16x256xf32>
    %176 = math.exp %175 : vector<16x256xf32>
    %177 = arith.addf %167, %176 : vector<16x256xf32>
    %cst_93 = arith.constant 4.000000e+00 : f32
    %178 = vector.broadcast %cst_93 : f32 to vector<16x256xf32>
    %179 = arith.cmpf oeq, %109, %178 : vector<16x256xf32>
    %180 = arith.select %179, %174, %170 : vector<16x256xi1>, vector<16x256xf32>
    %181 = vector.broadcast %10 : f32 to vector<16x256xf32>
    %182 = arith.select %179, %181, %172 : vector<16x256xi1>, vector<16x256xf32>
    %c0_94 = arith.constant 0 : index
    %c5_95 = arith.constant 5 : index
    %c0_96 = arith.constant 0 : index
    %c0_97 = arith.constant 0 : index
    %183 = vector.load %arg3[%c0_94, %c5_95, %c0_96, %c0_97] : memref<1x8x16x256xf32, #tpu.memory_space<vmem>>, vector<1x1x16x256xf32>
    %184 = vector.shape_cast %183 : vector<1x1x16x256xf32> to vector<16x256xf32>
    %185 = arith.subf %184, %132 : vector<16x256xf32>
    %186 = math.exp %185 : vector<16x256xf32>
    %187 = arith.addf %177, %186 : vector<16x256xf32>
    %cst_98 = arith.constant 5.000000e+00 : f32
    %188 = vector.broadcast %cst_98 : f32 to vector<16x256xf32>
    %189 = arith.cmpf oeq, %109, %188 : vector<16x256xf32>
    %190 = arith.select %189, %184, %180 : vector<16x256xi1>, vector<16x256xf32>
    %191 = vector.broadcast %11 : f32 to vector<16x256xf32>
    %192 = arith.select %189, %191, %182 : vector<16x256xi1>, vector<16x256xf32>
    %c0_99 = arith.constant 0 : index
    %c6_100 = arith.constant 6 : index
    %c0_101 = arith.constant 0 : index
    %c0_102 = arith.constant 0 : index
    %193 = vector.load %arg3[%c0_99, %c6_100, %c0_101, %c0_102] : memref<1x8x16x256xf32, #tpu.memory_space<vmem>>, vector<1x1x16x256xf32>
    %194 = vector.shape_cast %193 : vector<1x1x16x256xf32> to vector<16x256xf32>
    %195 = arith.subf %194, %132 : vector<16x256xf32>
    %196 = math.exp %195 : vector<16x256xf32>
    %197 = arith.addf %187, %196 : vector<16x256xf32>
    %cst_103 = arith.constant 6.000000e+00 : f32
    %198 = vector.broadcast %cst_103 : f32 to vector<16x256xf32>
    %199 = arith.cmpf oeq, %109, %198 : vector<16x256xf32>
    %200 = arith.select %199, %194, %190 : vector<16x256xi1>, vector<16x256xf32>
    %201 = vector.broadcast %12 : f32 to vector<16x256xf32>
    %202 = arith.select %199, %201, %192 : vector<16x256xi1>, vector<16x256xf32>
    %c0_104 = arith.constant 0 : index
    %c7_105 = arith.constant 7 : index
    %c0_106 = arith.constant 0 : index
    %c0_107 = arith.constant 0 : index
    %203 = vector.load %arg3[%c0_104, %c7_105, %c0_106, %c0_107] : memref<1x8x16x256xf32, #tpu.memory_space<vmem>>, vector<1x1x16x256xf32>
    %204 = vector.shape_cast %203 : vector<1x1x16x256xf32> to vector<16x256xf32>
    %205 = arith.subf %204, %132 : vector<16x256xf32>
    %206 = math.exp %205 : vector<16x256xf32>
    %207 = arith.addf %197, %206 : vector<16x256xf32>
    %cst_108 = arith.constant 7.000000e+00 : f32
    %208 = vector.broadcast %cst_108 : f32 to vector<16x256xf32>
    %209 = arith.cmpf oeq, %109, %208 : vector<16x256xf32>
    %210 = arith.select %209, %204, %200 : vector<16x256xi1>, vector<16x256xf32>
    %211 = vector.broadcast %13 : f32 to vector<16x256xf32>
    %212 = arith.select %209, %211, %202 : vector<16x256xi1>, vector<16x256xf32>
    %213 = math.log %207 : vector<16x256xf32>
    %214 = arith.addf %132, %213 : vector<16x256xf32>
    %215 = arith.subf %214, %210 : vector<16x256xf32>
    %216 = arith.mulf %212, %215 : vector<16x256xf32>
    %217 = vector.shape_cast %216 : vector<16x256xf32> to vector<1x16x256xf32>
    %cst_109 = arith.constant dense<0.000000e+00> : vector<1xf32>
    %218 = vector.multi_reduction <add>, %217, %cst_109 [1, 2] : vector<1x16x256xf32> to vector<1xf32>
    %219 = vector.shape_cast %218 : vector<1xf32> to vector<1x1x1xf32>
    %220 = vector.extract %219[0, 0, 0] : f32 from vector<1x1x1xf32>
    %221 = vector.broadcast %220 : f32 to vector<1x1xf32>
    %222 = vector.shape_cast %221 : vector<1x1xf32> to vector<1x1x1xf32>
    %c0_110 = arith.constant 0 : index
    %c0_111 = arith.constant 0 : index
    %c0_112 = arith.constant 0 : index
    %223 = vector.load %arg4[%c0_110, %c0_111, %c0_112] : memref<1x1x1xf32, #tpu.memory_space<vmem>>, vector<1x1x1xf32>
    tpu.vector_store %arg4[%c0_110, %c0_111, %c0_112], %222 {strides = array<i32>} : memref<1x1x1xf32, #tpu.memory_space<vmem>>, vector<1x1x1xf32>,
    return
  }
  func.func @transform_0(%arg0: i32) -> (i32, i32) {
    %c0_i32 = arith.constant 0 : i32
    %c0_i32_0 = arith.constant 0 : i32
    %c0_i32_1 = arith.constant 0 : i32
    return %c0_i32, %c0_i32_0 : i32, i32
  }
  func.func @transform_1(%arg0: i32) -> i32 {
    %c0_i32 = arith.constant 0 : i32
    %c0_i32_0 = arith.constant 0 : i32
    return %c0_i32 : i32
  }
  func.func @transform_2(%arg0: i32) -> (i32, i32, i32, i32) {
    %c0_i32 = arith.constant 0 : i32
    %c0_i32_0 = arith.constant 0 : i32
    %c0_i32_1 = arith.constant 0 : i32
    %c0_i32_2 = arith.constant 0 : i32
    return %arg0, %c0_i32, %c0_i32_0, %c0_i32_1 : i32, i32, i32, i32
  }
  func.func @transform_3(%arg0: i32) -> (i32, i32, i32) {
    %c0_i32 = arith.constant 0 : i32
    %c0_i32_0 = arith.constant 0 : i32
    %c0_i32_1 = arith.constant 0 : i32
    return %arg0, %c0_i32, %c0_i32_0 : i32, i32, i32
  }
}

</mosaic_0001>

<bundles_post_ra>
// kernel: tpu_custom_call.1
= control target key start
LH: loop header
LB: loop body
LE: loop exit
PB: predicated region body
PF: predicated region fallthrough
CT: control target
= control target key end

     0   :  { %8 = vsyncpa [#allocation4], 0  ;;  %s1665_s0 = inlined_call_operand.hbm [shape: f32[2,3], index: 0, kind: input, shape index: {}]   ;;  %s1666_s1 = inlined_call_operand.vmem [shape: f32[8], index: 1, kind: input, shape index: {}]   ;;  %s1667_s2 = inlined_call_operand.hbm [shape: f32[2,8,16,256], index: 2, kind: input, shape index: {}]   ;;  %s1668_s3 = inlined_call_operand.vmem [shape: f32[2,1,1], index: 3, kind: output, shape index: {}]  }
   0x1   :  { %9 = vsyncpa [#allocation5], 0 }
   0x2   :  { %10 = vsyncpa [#allocation3], 0 }
   0x3   :  { %12 = vsyncpa [#allocation3 + $0x1], 0  ;;  %s1072_s12 = smov 0   ;;  %s1074_s13 = smov 0  }
   0x4   :  { %s1076_s14 = smov 0   ;;  %s1078_s15 = smov 0  }
   0x5 LB: > { %s1091_s16 = sadd.s32 4294967295, %s1044_s15   ;;  %s1094_s17 = sadd.s32 1, %s1044_s15   ;;  %s1044_s15 = sphi %s1078_s15, %s1698_s15   ;;  %s1040_s14 = sphi %s1076_s14, %s1697_s14   ;;  %s1036_s13 = sphi %s1074_s13, %s1696_s13   ;;  %s1032_s12 = sphi %s1072_s12, %s1695_s12  }
   0x6   : > { %s64_s18 = ssub.s32 %s1044_s15, %s1094_s17  ;;  %s67_s19 = sadd.s32 1, %s1040_s14 }
   0x7   : > { %p65_p0 = scmp.eq.s32.totalorder %s64_s18, 0  ;;  %p74_p1 = scmp.ne.s32.totalorder %s1040_s14, %s1036_s13 }
   0x8   : > { %p75_p2 = scmp.eq.s32.totalorder %s1044_s15, 0  ;;  %p80_p3 = scmp.ne.s32.totalorder %s1036_s13, %s1032_s12 }
   0x9   : > { %s1104_s20 = scalar_select %p65_p0, %s1040_s14, %s67_s19  }
   0xa   : > { %p76_p4 = por %p75_p2, %p74_p1  ;;  %p1669_p5 = scmp.eq.s32.totalorder %s1091_s16, 0 }
   0xb   : > { %p757_p6 = scmp.ge.s32.totalorder %s1044_s15, 1  ;;  %p117_p7 = scmp.lt.s32.totalorder %s1044_s15, 3 }
   0xc   : > { %p1111_p8 = por %p1669_p5, %p80_p3  ;;  %p832_p10 = scmp.lt.s32.totalorder %s1044_s15, 2 }
   0xd   : > { %p1115_p9 = pnand %p757_p6, %p117_p7  ;;  %s139_s25 = sshll.u32 %s1666_s1, 4  ;;  %s140_s25 = int_to_ptr.vmem [resolvable:$true] %s139_s25 }
   0xe   : > { %s1676_s21 = scalar_select %p1111_p8, 1, 0 }
   0xf   : > { %p819_p11 = pneg %p1115_p9  ;;  %p1125_p12 = pnand %p832_p10, %p76_p4 }
  0x10   : > { %s150_s28 = sand.u32 1, %s1040_s14   ;;  %s944_s4 = scalar_lea.hbm %s1665_s0, 32 }
  0x11   : > { %p1131_p13 = pnand %p819_p11, %p1669_p5  ;;  %p945_p0 = scmp.ne.s32.totalorder %s1665_s0, %s944_s4 }
  0x12   : > { %p951_p4 = scmp.lt.u32.totalorder %s944_s4, %s1665_s0 }
  0x13   : > { %p946_p1 = pneg %p1131_p13 }
  0x15   : > { %p947_p2 = pnand %p946_p1, %p945_p0 }
  0x17   : > { %p948_p3 = pneg %p947_p2 }
  0x19   : > { %p953_p6 = pnand %p951_p4, %p948_p3 }
  0x1b   : > { %956 = shalt.err (!%p953_p6)
}
  0x1c   : > { %s1046_s9 = smov [#allocation2]   ;;  %s957_s12 = scalar_lea.vmem %s140_s25, 16 }
  0x1d   : > { %822 = dma.hbm_to_smem (!%p1131_p13), %s1665_s0, 32, %s1046_s9, [#allocation4]  }
  0x1e   : > { %p958_p7 = scmp.ne.s32.totalorder %s140_s25, %s957_s12  ;;  %p965_p5 = scmp.lt.s32.totalorder %s140_s25, %s140_s25 }
  0x1f   : > { %p966_p0 = scmp.lt.s32.totalorder %s957_s12, %s957_s12 }
  0x20   : > { %p960_p10 = pnand %p958_p7, %p946_p1 }
  0x21   : > { %p967_p2 = por %p966_p0, %p965_p5 }
  0x22   : > { %p961_p11 = pneg %p960_p10 }
  0x24   : > { %p968_p8 = pnand %p967_p2, %p961_p11 }
  0x26   : > { %971 = shalt.err (!%p968_p8)
}
  0x27   : > { %s1047_s18 = smov [#allocation6]   ;;  %s761_s19 = sshll.u32 %s150_s28, 8 }
  0x28   : > { %825 = dma.vmem_to_smem (!%p1131_p13), %s140_s25, 16, %s1047_s18, [#allocation5]  }
  0x29   : > { %s806_s23 = sshll.u32 %s1044_s15, 12  ;;  %s154_s4 = scalar_lea.vmem [#allocation7], %s761_s19 }
  0x2a   : > { %s1158_s30 = scalar_lea.hbm %s1667_s2, %s806_s23  ;;  %s161_s5 = sshll.u32 %s154_s4, 4  ;;  %s1160_s5 = int_to_ptr.vmem [resolvable:$true] %s161_s5 }
  0x2b   : > { %s1162_s27 = scalar_lea.sflag [#allocation3], %s150_s28  ;;  %s972_s6 = scalar_lea.hbm %s1158_s30, 4096 }
  0x2c   : > { %p973_p5 = scmp.ne.s32.totalorder %s1158_s30, %s972_s6  ;;  %p974_p8 = pneg %p1125_p12 }
  0x2d   : > { %s977_s7 = scalar_lea.hbm %s1667_s2, 8192  ;;  %p978_p3 = scmp.lt.u32.totalorder %s1158_s30, %s1667_s2 }
  0x2e   : > { %p975_p13 = pnand %p974_p8, %p973_p5  ;;  %p979_p4 = scmp.lt.u32.totalorder %s977_s7, %s972_s6 }
  0x2f   : > { %p981_p7 = scmp.lt.u32.totalorder %s972_s6, %s1158_s30 }
  0x30   : > { %p976_p1 = pneg %p975_p13  ;;  %p980_p6 = por %p979_p4, %p978_p3 }
  0x32   : > { %p982_p10 = por %p981_p7, %p980_p6 }
  0x34   : > { %p983_p11 = pnand %p982_p10, %p976_p1 }
  0x36   : > { %986 = shalt.err (!%p983_p11)
}
  0x37   : > { %s987_s28 = scalar_lea.vmem %s1160_s5, 4096  ;;  %s1048_s10 = smov [#allocation7]  }
  0x38   : > { %p988_p0 = scmp.ne.s32.totalorder %s1160_s5, %s987_s28  ;;  %s992_s11 = sshll.u32 %s1048_s10, 4  ;;  %s993_s11 = int_to_ptr.vmem [resolvable:$false] %s992_s11 }
  0x39   : > { %s994_s12 = scalar_lea.vmem %s993_s11, 8192  ;;  %p995_p13 = scmp.lt.s32.totalorder %s1160_s5, %s993_s11 }
  0x3a   : > { %p990_p2 = pnand %p988_p0, %p974_p8  ;;  %p996_p3 = scmp.lt.s32.totalorder %s994_s12, %s987_s28 }
  0x3c   : > { %p991_p5 = pneg %p990_p2  ;;  %p997_p4 = por %p996_p3, %p995_p13 }
  0x3e   : > { %p998_p6 = pnand %p997_p4, %p991_p5 }
  0x40   : > { %1001 = shalt.err (!%p998_p6)
}
  0x41   : > { %s1049_s18 = smov 256   ;;  %s1050_s19 = smov 16  }
  0x42   : > { %829 = dma.hbm_to_vmem [thread:$0]  (!%p1125_p12), %s1158_s30, 4096, %s1160_s5, %s1162_s27, %s1049_s18, %s1049_s18, %s1050_s19  }
  0x43   : > { %173 = sbr.rel (%p1115_p9) target bundleno = 405 (0x195), region = 32 }
  0x4a   : > { %p1680_p8 = scmp.eq.s32.totalorder %s1091_s16, 0 }
  0x4c   : > { %1019 = dma.done.wait (%p1680_p8), [#allocation4], 32   ;;  %p1681_p1 = pmov %p1680_p8 }
  0x4e   : > { %1021 = vsyncadd (%p1681_p1), [#allocation4], 4294967264  ;;  %p1682_p7 = pmov %p1681_p1 }
  0x4f   : > { %p1683_p10 = pmov %p1681_p1 }
  0x50   : > { %1023 = dma.done.wait (%p1682_p7), [#allocation5], 16  }
  0x51   : > { %1025 = vsyncadd (%p1683_p10), [#allocation5], 4294967280  ;;  %s183_s23 = sand.u32 1, %s1036_s13   ;;  %p1684_p9 = scmp.ne.s32.totalorder %s1676_s21, 0 }
  0x52   : > { %s767_s26 = sshll.u32 %s183_s23, 8  ;;  %s184_s24 = scalar_lea.sflag [#allocation3], %s183_s23 }
  0x53   : > { %s1201_s29 = scalar_lea.vmem [#allocation7], %s767_s26 }
  0x54   : > { %1027 = dma.done.wait (%p1684_p9), %s184_s24, 4096  }
  0x55   : > { %1029 = vsyncadd (%p1684_p9), %s184_s24, 4294963200 }
  0x56   : > { %192 = sfence }
  0x57   : > { %s768_s22 = sshll.u32 %s1091_s16, 7  ;;  %v226_v0 = vlaneseq  ;;  %v1209_v21 = vld [vmem:[%s1201_s29] sm:$0xff]  ;;  %v1215_v25 = vld [vmem:[%s1201_s29 + $0x8] sm:$0xff]  ;;  %v1221_v31 = vld [vmem:[%s1201_s29 + $0x10] sm:$0xff]  ;;  %s218_s21 = sld [smem:[#allocation6]] }
  0x58   : > { %s213_s30 = sld [smem:[#allocation2 + %s768_s22]]  ;;  %s214_s4 = sadd.s32 1, %s768_s22  ;;  %v1212_v22 = vld [vmem:[%s1201_s29 + $0x20] sm:$0xff]  ;;  %v1218_v26 = vld [vmem:[%s1201_s29 + $0x28] sm:$0xff]  ;;  %v1224_v32 = vld [vmem:[%s1201_s29 + $0x30] sm:$0xff] }
  0x59   : > { %s215_s5 = sld [smem:[#allocation2 + %s214_s4]]  ;;  %s216_s27 = sadd.s32 2, %s768_s22  ;;  %v232_v1 = vand.u32 127, %v226_v0  ;;  %v227_v10 = vshrl.u32 %v226_v0, 7  ;;  %v348_v35 = vmax.f32 %v1209_v21, %v1212_v22  ;;  %v349_v37 = vmax.f32 %v1215_v25, %v1218_v26  ;;  %v1231_v38 = vld [vmem:[%s1201_s29 + $0x40] sm:$0xff]  ;;  %v1234_v39 = vld [vmem:[%s1201_s29 + $0x18] sm:$0xff] }
  0x5a   : > { %s217_s6 = sld [smem:[#allocation2 + %s216_s27]]  ;;  %v1237_v40 = vld [vmem:[%s1201_s29 + $0x38] sm:$0xff]  ;;  %v350_v41 = vmax.f32 %v1221_v31, %v1224_v32  ;;  %v1242_v42 = vld [vmem:[%s1201_s29 + $0x48] sm:$0xff]  ;;  %v1245_v49 = vld [vmem:[%s1201_s29 + $0x50] sm:$0xff]  ;;  %p209_p12 = scmp.lt.s32.totalorder %s1091_s16, 1 }
  0x5b   : > { %v233_v8 = vadd.s32 128, %v232_v1  ;;  %v234_v14 = vshra.s32 %v232_v1, 4  ;;  %v228_v19 = vadd.s32 8, %v227_v10  ;;  %v229_v23 = vcvt.s32.f32 %v227_v10  ;;  %v1252_v54 = vld [vmem:[%s1201_s29 + $0x60] sm:$0xff]  ;;  %v1255_v55 = vld [vmem:[%s1201_s29 + $0x58] sm:$0xff]  ;;  %v1258_v56 = vld [vmem:[%s1201_s29 + $0x68] sm:$0xff] }
  0x5c   : > { %v238_v24 = vand.u32 15, %v232_v1  ;;  %v357_v50 = vmax.f32 %v348_v35, %v1231_v38  ;;  %v351_v52 = vmax.f32 %v1234_v39, %v1237_v40  ;;  %v358_v53 = vmax.f32 %v349_v37, %v1242_v42  ;;  %v1262_v63 = vld [vmem:[%s1201_s29 + $0x70] sm:$0xff]  ;;  %s769_s15 = sld [smem:[#allocation6 + $0x1]]  ;;  %s770_s25 = sld [smem:[#allocation6 + $0x2]] }
  0x5d   : > { %v235_v17 = vshra.s32 %v233_v8, 4  ;;  %v236_v27 = vcvt.s32.f32 %v234_v14  ;;  %v239_v34 = vand.u32 15, %v233_v8  ;;  %v230_v36 = vcvt.s32.f32 %v228_v19  ;;  %v1278_v10 = vld [vmem:[%s1201_s29 + $0x90] sm:$0xff]  ;;  %v1284_v14 = vld [vmem:[%s1201_s29 + $0xa0] sm:$0xff]  ;;  %v1287_v19 = vld [vmem:[%s1201_s29 + $0x98] sm:$0xff]  ;;  %s1462_s7 = sld [smem:[#allocation6 + $0x3]] }
  0x5e   : > { %v242_v2 = vstv %s213_s30  ;;  %v240_v43 = vcvt.s32.f32 %v238_v24  ;;  %v359_v60 = vmax.f32 %v350_v41, %v1245_v49  ;;  %v366_v0 = vmax.f32 %v357_v50, %v1252_v54  ;;  %1685 = vst [vmem:[#allocation11_spill] sm:$0xff] %v1284_v14  ;;  %1686 = vst [vmem:[#allocation12_spill] sm:$0xff] %v1287_v19  ;;  %v1291_v24 = vld [vmem:[%s1201_s29 + $0xa8] sm:$0xff]  ;;  %s1499_s8 = sld [smem:[#allocation6 + $0x4]]  ;;  %s1518_s9 = sld [smem:[#allocation6 + $0x5]] }
  0x5f   : > { %v244_v3 = vadd.f32 1.0, %v242_v2  ;;  %v265_v4 = vstv %s215_s5  ;;  %v237_v33 = vcvt.s32.f32 %v235_v17  ;;  %v241_v47 = vcvt.s32.f32 %v239_v34  ;;  %1687 = vst [vmem:[#allocation13_spill] sm:$0xff] %v1291_v24  ;;  %s1541_s28 = sld [smem:[#allocation6 + $0x6]]  ;;  %s1561_s10 = sld [smem:[#allocation6 + $0x7]] }
  0x60   : > { %v267_v6 = vadd.f32 1.0, %v265_v4  ;;  %v288_v7 = vstv %s217_s6  ;;  %v360_v2 = vmax.f32 %v351_v52, %v1255_v55  ;;  %v1268_v4 = vld [vmem:[%s1201_s29 + $0x80] sm:$0xff]  ;;  %v368_v8 = vmax.f32 %v359_v60, %v1262_v63  ;;  %s1700_s16 = smov (!%p209_p12, %s1091_s16), 1 }
  0x61   : > { %v245_v5 = vmul.f32 8.0, %v244_v3  ;;  %v290_v9 = vadd.f32 1.0, %v288_v7  ;;  %v367_v3 = vmax.f32 %v358_v53, %v1258_v56  ;;  %s211_s18 = scalar_lea.vmem %s1668_s3, %s1700_s16 }
  0x62   : > { %v268_v12 = vmul.f32 8.0, %v267_v6  ;;  %v1274_v6 = vld [vmem:[%s1201_s29 + $0x88] sm:$0xff] }
  0x63   : > { %v246_v11 = vfloor.f32 %v245_v5  ;;  %v291_v13 = vmul.f32 8.0, %v290_v9  ;;  %v1271_v5 = vld [vmem:[%s1201_s29 + $0x78] sm:$0xff] }
  0x64   : > { %v269_v16 = vfloor.f32 %v268_v12  ;;  %v369_v12 = vmax.f32 %v360_v2, %v1271_v5 }
  0x65   : > { %v247_v15 = vmax.f32 %v246_v11, 0.0  ;;  %v292_v18 = vfloor.f32 %v291_v13  ;;  %v375_v11 = vmax.f32 %v366_v0, %v1268_v4  ;;  %v376_v13 = vmax.f32 %v367_v3, %v1274_v6  ;;  %v1315_v0 = vld [vmem:[%s1201_s29 + $0xe0] sm:$0xff] }
  0x66   : > { %v270_v20 = vmax.f32 %v269_v16, 0.0 }
  0x67   : > { %v248_v28 = vmin.f32 %v247_v15, 15.0  ;;  %v293_v30 = vmax.f32 %v292_v18, 0.0  ;;  %v1051_v15 = vmov 0.0  }
  0x68   : > { %v271_v29 = vmin.f32 %v270_v20, 15.0  ;;  %v377_v20 = vmax.f32 %v368_v8, %v1278_v10  ;;  %v1320_v8 = vld [vmem:[%s1201_s29 + $0xe8] sm:$0xff] }
  0x69   : > { %v249_v44 = vsub.f32 %v248_v28, %v229_v23  ;;  %v294_v46 = vmin.f32 %v293_v30, 15.0  ;;  %v250_v51 = vsub.f32 %v248_v28, %v230_v36  ;;  %v384_v28 = vmax.f32 %v375_v11, %v1284_v14  ;;  %v1323_v11 = vld [vmem:[%s1201_s29 + $0xd8] sm:$0xff] }
  0x6a   : > { %v272_v45 = vsub.f32 %v271_v29, %v236_v27  ;;  %v273_v48 = vsub.f32 %v271_v29, %v237_v33  ;;  %v1294_v27 = vld [vmem:[%s1201_s29 + $0xb0] sm:$0xff] }
  0x6b   : > { %v251_v57 = vand.u32 2147483647, %v249_v44  ;;  %v295_v59 = vsub.f32 %v294_v46, %v240_v43  ;;  %v296_v62 = vsub.f32 %v294_v46, %v241_v47  ;;  %v252_v1 = vand.u32 2147483647, %v250_v51  ;;  %1688 = vst [vmem:[#allocation14_spill] sm:$0xff] %v1294_v27  ;;  %v1299_v44 = vld [vmem:[%s1201_s29 + $0xb8] sm:$0xff] }
  0x6c   : > { %v274_v58 = vand.u32 2147483647, %v272_v45  ;;  %v275_v61 = vand.u32 2147483647, %v273_v48  ;;  %v378_v43 = vmax.f32 %v369_v12, %v1287_v19  ;;  %1689 = vst [vmem:[#allocation15_spill] sm:$0xff] %v1299_v44  ;;  %v385_v45 = vmax.f32 %v376_v13, %v1291_v24  ;;  %v1303_v46 = vld [vmem:[%s1201_s29 + $0xc0] sm:$0xff] }
  0x6d   : > { %vm253_vm0 = vcmp.eq.f32.partialorder %v251_v57, 0.0  ;;  %v297_v7 = vand.u32 2147483647, %v295_v59  ;;  %v298_v9 = vand.u32 2147483647, %v296_v62  ;;  %vm254_vm3 = vcmp.eq.f32.partialorder %v252_v1, 0.0 }
  0x6e   : > { %vm276_vm1 = vcmp.eq.f32.partialorder %v274_v58, 0.0  ;;  %vm277_vm2 = vcmp.eq.f32.partialorder %v275_v61, 0.0  ;;  %v255_v16 = vsel %vm253_vm0, 0.19947115, %v1051_v15  ;;  %vm257_vm4 = vcmp.eq.f32.partialorder %v251_v57, 1.0  ;;  %v1307_v51 = vld [vmem:[%s1201_s29 + $0xc8] sm:$0xff] }
  0x6f   : > { %v278_v17 = vsel %vm276_vm1, 0.19947115, %v1051_v15  ;;  %vm280_vm5 = vcmp.eq.f32.partialorder %v274_v58, 1.0  ;;  %v279_v18 = vsel %vm277_vm2, 0.19947115, %v1051_v15  ;;  %vm281_vm6 = vcmp.eq.f32.partialorder %v275_v61, 1.0 }
  0x70   : > { %vm299_vm7 = vcmp.eq.f32.partialorder %v297_v7, 0.0  ;;  %v256_v23 = vsel %vm254_vm3, 0.19947115, %v1051_v15  ;;  %vm258_vm8 = vcmp.eq.f32.partialorder %v252_v1, 1.0  ;;  %vm300_vm9 = vcmp.eq.f32.partialorder %v298_v9, 0.0  ;;  %v1326_v12 = vld [vmem:[%s1201_s29 + $0xf0] sm:$0xff] }
  0x71   : > { %v259_v29 = vsel %vm257_vm4, 0.1873858, %v255_v16  ;;  %vm261_vm10 = vcmp.eq.f32.partialorder %v251_v57, 2.0  ;;  %v282_v30 = vsel %vm280_vm5, 0.1873858, %v278_v17  ;;  %vm284_vm11 = vcmp.eq.f32.partialorder %v274_v58, 2.0 }
  0x72   : > { %v283_v33 = vsel %vm281_vm6, 0.1873858, %v279_v18  ;;  %vm285_vm12 = vcmp.eq.f32.partialorder %v275_v61, 2.0  ;;  %v301_v34 = vsel %vm299_vm7, 0.19947115, %v1051_v15  ;;  %vm303_vm13 = vcmp.eq.f32.partialorder %v297_v7, 1.0 }
  0x73   : > { %v260_v35 = vsel %vm258_vm8, 0.1873858, %v256_v23  ;;  %vm262_vm14 = vcmp.eq.f32.partialorder %v252_v1, 2.0  ;;  %v302_v36 = vsel %vm300_vm9, 0.19947115, %v1051_v15  ;;  %vm304_vm15 = vcmp.eq.f32.partialorder %v298_v9, 1.0 }
  0x74   : > { %v263_v37 = vsel %vm261_vm10, 0.15534827, %v259_v29  ;;  %v286_v41 = vsel %vm284_vm11, 0.15534827, %v282_v30  ;;  %v287_v47 = vsel %vm285_vm12, 0.15534827, %v283_v33  ;;  %v386_v50 = vmax.f32 %v377_v20, %v1294_v27 }
  0x75   : > { %v305_v48 = vsel %vm303_vm13, 0.1873858, %v301_v34  ;;  %vm307_vm0 = vcmp.eq.f32.partialorder %v297_v7, 2.0  ;;  %v264_v52 = vsel %vm262_vm14, 0.15534827, %v260_v35  ;;  %vm308_vm1 = vcmp.eq.f32.partialorder %v298_v9, 2.0 }
  0x76   : > { %v306_v53 = vsel %vm304_vm15, 0.1873858, %v302_v36  ;;  %v1310_v57 = vld [vmem:[%s1201_s29 + $0xd0] sm:$0xff]  ;;  %v311_v58 = vmul.f32 %v286_v41, %v263_v37  ;;  %v393_v59 = vmax.f32 %v384_v28, %v1303_v46  ;;  %v309_v60 = vsel %vm307_vm0, 0.15534827, %v305_v48  ;;  %v1339_v29 = vld [vmem:[%s1201_s29 + $0xf8] sm:$0xff] }
  0x77   : > { %v312_v61 = vmul.f32 %v287_v47, %v263_v37  ;;  %v394_v62 = vmax.f32 %v385_v45, %v1307_v51  ;;  %v310_v1 = vsel %vm308_vm1, 0.15534827, %v306_v53  ;;  %v313_v2 = vmul.f32 %v286_v41, %v264_v52 }
  0x78   : > { %v387_v3 = vmax.f32 %v378_v43, %v1299_v44  ;;  %v395_v7 = vmax.f32 %v386_v50, %v1310_v57  ;;  %v314_v9 = vmul.f32 %v287_v47, %v264_v52  ;;  %v315_v13 = vmul.f32 %v311_v58, %v309_v60 }
  0x79   : > { %v1329_v15 = vmax.f32 %v393_v59, %v1315_v0  ;;  %v316_v16 = vmul.f32 %v312_v61, %v310_v1  ;;  %v1332_v17 = vmax.f32 %v394_v62, %v1320_v8  ;;  %v317_v18 = vmul.f32 %v313_v2, %v309_v60 }
  0x7a   : > { %v396_v20 = vmax.f32 %v387_v3, %v1323_v11  ;;  %v1336_v23 = vmax.f32 %v395_v7, %v1326_v12  ;;  %v318_v28 = vmul.f32 %v314_v9, %v310_v1  ;;  %v319_v30 = vmul.f32 125.99687, %v315_v13 }
  0x7b   : > { %v406_v33 = vsub.f32 %v1209_v21, %v1329_v15  ;;  %v320_v34 = vmul.f32 125.99687, %v316_v16  ;;  %v407_v35 = vsub.f32 %v1215_v25, %v1332_v17  ;;  %v321_v36 = vmul.f32 125.99687, %v317_v18 }
  0x7c   : > { %v1346_v37 = vmax.f32 %v396_v20, %v1339_v29  ;;  %v408_v41 = vsub.f32 %v1221_v31, %v1336_v23  ;;  %v322_v43 = vmul.f32 125.99687, %v318_v28  ;;  %v435_v45 = vsub.f32 %v1212_v22, %v1329_v15 }
  0x7d   : > { %v323_v47 = vmul.f32 8.0, %v319_v30  ;;  %v410_v48 = vmul.f32 1.442695, %v406_v33  ;;  %v436_v50 = vsub.f32 %v1218_v26, %v1332_v17  ;;  %v324_v52 = vmul.f32 8.0, %v320_v34 }
  0x7e   : > { %v412_v53 = vmul.f32 1.442695, %v407_v35  ;;  %v1354_v58 = vstv %s218_s21  ;;  %v437_v59 = vsub.f32 %v1224_v32, %v1336_v23  ;;  %v325_v60 = vmul.f32 8.0, %v321_v36 }
  0x7f   : > { %v409_v61 = vsub.f32 %v1234_v39, %v1346_v37  ;;  %v414_v62 = vmul.f32 1.442695, %v408_v41  ;;  %v1360_v1 = vstv %s769_s15  ;;  %v326_v2 = vmul.f32 8.0, %v322_v43 }
  0x80   : > { %v438_v3 = vsub.f32 %v1237_v40, %v1346_v37  ;;  %v439_v7 = vmul.f32 1.442695, %v435_v45  ;;  %v1364_v9 = vstv %s770_s25  ;;  %v327_v13 = vfloor.f32 %v323_v47 }
  0x81   : > { %872 = vpow2.f32 %v410_v48  ;;  %v441_v16 = vmul.f32 1.442695, %v436_v50  ;;  %v464_v18 = vsub.f32 %v1231_v38, %v1329_v15  ;;  %v328_v20 = vfloor.f32 %v324_v52 }
  0x82   : > { %874 = vpow2.f32 %v412_v53  ;;  %v443_v28 = vmul.f32 1.442695, %v437_v59  ;;  %v465_v30 = vsub.f32 %v1242_v42, %v1332_v17  ;;  %v329_v33 = vfloor.f32 %v325_v60 }
  0x83   : > { %876 = vpow2.f32 %v414_v62  ;;  %v416_v34 = vmul.f32 1.442695, %v409_v61  ;;  %v466_v35 = vsub.f32 %v1245_v49, %v1336_v23  ;;  %v330_v36 = vfloor.f32 %v326_v2 }
  0x84   : > { %878 = vpow2.f32 %v439_v7  ;;  %v445_v41 = vmul.f32 1.442695, %v438_v3  ;;  %v467_v43 = vsub.f32 %v1255_v55, %v1346_v37  ;;  %v331_v45 = vmax.f32 %v327_v13, 0.0 }
  0x85   : > { %880 = vpow2.f32 %v441_v16  ;;  %v468_v47 = vmul.f32 1.442695, %v464_v18  ;;  %v493_v48 = vsub.f32 %v1252_v54, %v1329_v15  ;;  %v332_v50 = vmax.f32 %v328_v20, 0.0 }
  0x86   : > { %882 = vpow2.f32 %v443_v28  ;;  %v470_v52 = vmul.f32 1.442695, %v465_v30  ;;  %v494_v53 = vsub.f32 %v1258_v56, %v1332_v17  ;;  %v333_v59 = vmax.f32 %v329_v33, 0.0 }
  0x87   : > { %884 = vpow2.f32 %v416_v34  ;;  %v472_v60 = vmul.f32 1.442695, %v466_v35  ;;  %v495_v61 = vsub.f32 %v1262_v63, %v1336_v23  ;;  %v334_v62 = vmax.f32 %v330_v36, 0.0 }
  0x88   : > { %886 = vpow2.f32 %v445_v41  ;;  %v474_v2 = vmul.f32 1.442695, %v467_v43  ;;  %v496_v3 = vsub.f32 %v1271_v5, %v1346_v37  ;;  %v1382_v7 = vmin.f32 %v331_v45, 7.0 }
  0x89   : > { %888 = vpow2.f32 %v468_v47  ;;  %v497_v13 = vmul.f32 1.442695, %v493_v48  ;;  %v522_v16 = vsub.f32 %v1268_v4, %v1329_v15  ;;  %v1386_v18 = vmin.f32 %v332_v50, 7.0 }
  0x8a   : > { %890 = vpow2.f32 %v470_v52  ;;  %v499_v20 = vmul.f32 1.442695, %v494_v53  ;;  %v523_v28 = vsub.f32 %v1274_v6, %v1332_v17  ;;  %v1390_v33 = vmin.f32 %v333_v59, 7.0 }
  0x8b   : > { %v873_v30 = vpop.eup %872  ;;  %892 = vpow2.f32 %v472_v60  ;;  %v501_v34 = vmul.f32 1.442695, %v495_v61  ;;  %v524_v35 = vsub.f32 %v1278_v10, %v1336_v23  ;;  %v1394_v41 = vmin.f32 %v334_v62, 7.0 }
  0x8c   : > { %v875_v36 = vpop.eup %874  ;;  %894 = vpow2.f32 %v474_v2  ;;  %v503_v43 = vmul.f32 1.442695, %v496_v3  ;;  %v525_v45 = vsub.f32 %v1287_v19, %v1346_v37  ;;  %vm422_vm2 = vcmp.eq.f32.partialorder %v1382_v7, 0.0 }
  0x8d   : > { %v877_v47 = vpop.eup %876  ;;  %896 = vpow2.f32 %v497_v13  ;;  %v526_v48 = vmul.f32 1.442695, %v522_v16  ;;  %v551_v50 = vsub.f32 %v1284_v14, %v1329_v15  ;;  %vm423_vm3 = vcmp.eq.f32.partialorder %v1386_v18, 0.0 }
  0x8e   : > { %v879_v52 = vpop.eup %878  ;;  %898 = vpow2.f32 %v499_v20  ;;  %v528_v53 = vmul.f32 1.442695, %v523_v28  ;;  %v552_v59 = vsub.f32 %v1291_v24, %v1332_v17  ;;  %vm424_vm4 = vcmp.eq.f32.partialorder %v1390_v33, 0.0 }
  0x8f   : > { %v881_v60 = vpop.eup %880  ;;  %900 = vpow2.f32 %v501_v34  ;;  %v530_v61 = vmul.f32 1.442695, %v524_v35  ;;  %v553_v62 = vsub.f32 %v1294_v27, %v1336_v23  ;;  %vm425_vm5 = vcmp.eq.f32.partialorder %v1394_v41, 0.0 }
  0x90   : > { %v883_v2 = vpop.eup %882  ;;  %902 = vpow2.f32 %v503_v43  ;;  %v532_v3 = vmul.f32 1.442695, %v525_v45  ;;  %v554_v13 = vsub.f32 %v1299_v44, %v1346_v37  ;;  %v1413_v20 = vsel %vm422_vm2, %v1209_v21, 0.0 }
  0x91   : > { %v885_v16 = vpop.eup %884  ;;  %v1418_v28 = vsel %vm423_vm3, %v1215_v25, 0.0  ;;  %904 = vpow2.f32 %v526_v48  ;;  %v555_v34 = vmul.f32 1.442695, %v551_v50  ;;  %v447_v27 = vadd.f32 %v879_v52, %v873_v30 }
  0x92   : > { %v887_v35 = vpop.eup %886  ;;  %906 = vpow2.f32 %v528_v53  ;;  %v557_v43 = vmul.f32 1.442695, %v552_v59  ;;  %v580_v45 = vsub.f32 %v1303_v46, %v1329_v15  ;;  %v448_v24 = vadd.f32 %v881_v60, %v875_v36 }
  0x93   : > { %v889_v44 = vpop.eup %888  ;;  %v449_v14 = vadd.f32 %v883_v2, %v877_v47  ;;  %vm451_vm6 = vcmp.eq.f32.partialorder %v1382_v7, 1.0  ;;  %908 = vpow2.f32 %v530_v61  ;;  %v559_v21 = vmul.f32 1.442695, %v553_v62 }
  0x94   : > { %v891_v19 = vpop.eup %890  ;;  %vm452_vm7 = vcmp.eq.f32.partialorder %v1386_v18, 1.0  ;;  %910 = vpow2.f32 %v532_v3  ;;  %v561_v25 = vmul.f32 1.442695, %v554_v13  ;;  %v581_v30 = vsub.f32 %v1307_v51, %v1332_v17 }
  0x95   : > { %v582_v48 = vsub.f32 %v1310_v57, %v1336_v23  ;;  %v893_v50 = vpop.eup %892  ;;  %v450_v52 = vadd.f32 %v887_v35, %v885_v16  ;;  %912 = vpow2.f32 %v555_v34  ;;  %v583_v36 = vsub.f32 %v1323_v11, %v1346_v37 }
  0x96   : > { %v584_v47 = vmul.f32 1.442695, %v580_v45  ;;  %v895_v53 = vpop.eup %894  ;;  %v428_v59 = vsel %vm424_vm4, %v1221_v31, 0.0  ;;  %v476_v60 = vadd.f32 %v889_v44, %v447_v27  ;;  %914 = vpow2.f32 %v557_v43 }
  0x97   : > { %v586_v61 = vmul.f32 1.442695, %v581_v30  ;;  %v897_v62 = vpop.eup %896  ;;  %v429_v2 = vsel %vm425_vm5, %v1234_v39, 0.0  ;;  %v477_v3 = vadd.f32 %v891_v19, %v448_v24  ;;  %916 = vpow2.f32 %v559_v21 }
  0x98   : > { %v588_v13 = vmul.f32 1.442695, %v582_v48  ;;  %v899_v16 = vpop.eup %898  ;;  %v431_v34 = vsel %vm422_vm2, %v1354_v58, 0.0  ;;  %v478_v35 = vadd.f32 %v893_v50, %v449_v14  ;;  %918 = vpow2.f32 %v561_v25 }
  0x99   : > { %v590_v45 = vmul.f32 1.442695, %v583_v36  ;;  %v901_v31 = vpop.eup %900  ;;  %v432_v27 = vsel %vm423_vm3, %v1354_v58, 0.0  ;;  %v433_v39 = vsel %vm424_vm4, %v1354_v58, 0.0  ;;  %v479_v19 = vadd.f32 %v895_v53, %v450_v52 }
  0x9a   : > { %920 = vpow2.f32 %v584_v47  ;;  %v903_v24 = vpop.eup %902  ;;  %v434_v44 = vsel %vm425_vm5, %v1354_v58, 0.0  ;;  %vm453_vm8 = vcmp.eq.f32.partialorder %v1390_v33, 1.0  ;;  %v505_v14 = vadd.f32 %v897_v62, %v476_v60 }
  0x9b   : > { %922 = vpow2.f32 %v586_v61  ;;  %v905_v43 = vpop.eup %904  ;;  %v506_v21 = vadd.f32 %v899_v16, %v477_v3  ;;  %v609_v25 = vsub.f32 %v1315_v0, %v1329_v15  ;;  %v610_v30 = vsub.f32 %v1320_v8, %v1332_v17 }
  0x9c   : > { %924 = vpow2.f32 %v588_v13  ;;  %v907_v48 = vpop.eup %906  ;;  %v507_v50 = vadd.f32 %v901_v31, %v478_v35  ;;  %v611_v52 = vsub.f32 %v1326_v12, %v1336_v23  ;;  %v612_v58 = vsub.f32 %v1339_v29, %v1346_v37 }
  0x9d   : > { %926 = vpow2.f32 %v590_v45  ;;  %v909_v36 = vpop.eup %908  ;;  %vm454_vm9 = vcmp.eq.f32.partialorder %v1394_v41, 1.0  ;;  %v508_v47 = vadd.f32 %v903_v24, %v479_v19  ;;  %v613_v53 = vmul.f32 1.442695, %v609_v25 }
  0x9e   : > { %v615_v60 = vmul.f32 1.442695, %v610_v30  ;;  %v911_v61 = vpop.eup %910  ;;  %v455_v62 = vsel %vm451_vm6, %v1212_v22, %v1413_v20  ;;  %v534_v3 = vadd.f32 %v905_v43, %v505_v14  ;;  %v617_v13 = vmul.f32 1.442695, %v611_v52 }
  0x9f   : > { %v619_v16 = vmul.f32 1.442695, %v612_v58  ;;  %v913_v35 = vpop.eup %912  ;;  %v456_v45 = vsel %vm452_vm7, %v1218_v26, %v1418_v28  ;;  %v457_v31 = vsel %vm453_vm8, %v1224_v32, %v428_v59  ;;  %v535_v19 = vadd.f32 %v907_v48, %v506_v21 }
  0xa0   : > { %928 = vpow2.f32 %v613_v53  ;;  %v915_v24 = vpop.eup %914  ;;  %v458_v22 = vsel %vm454_vm9, %v1237_v40, %v429_v2  ;;  %vm480_vm10 = vcmp.eq.f32.partialorder %v1382_v7, 2.0  ;;  %v536_v20 = vadd.f32 %v909_v36, %v507_v50 }
  0xa1   : > { %930 = vpow2.f32 %v615_v60  ;;  %v917_v14 = vpop.eup %916  ;;  %vm481_vm11 = vcmp.eq.f32.partialorder %v1386_v18, 2.0  ;;  %vm482_vm12 = vcmp.eq.f32.partialorder %v1390_v33, 2.0  ;;  %v537_v26 = vadd.f32 %v911_v61, %v508_v47 }
  0xa2   : > { %932 = vpow2.f32 %v617_v13  ;;  %v919_v28 = vpop.eup %918  ;;  %v460_v32 = vsel %vm451_vm6, %v1360_v1, %v431_v34  ;;  %vm483_vm13 = vcmp.eq.f32.partialorder %v1394_v41, 2.0  ;;  %v563_v59 = vadd.f32 %v913_v35, %v534_v3 }
  0xa3   : > { %934 = vpow2.f32 %v619_v16  ;;  %v461_v2 = vsel %vm452_vm7, %v1360_v1, %v432_v27  ;;  %v462_v43 = vsel %vm453_vm8, %v1360_v1, %v433_v39  ;;  %v463_v21 = vsel %vm454_vm9, %v1360_v1, %v434_v44 }
  0xa4   : > { %v921_v40 = vpop.eup %920  ;;  %v564_v25 = vadd.f32 %v915_v24, %v535_v19  ;;  %v484_v34 = vsel %vm480_vm10, %v1231_v38, %v455_v62  ;;  %v485_v48 = vsel %vm481_vm11, %v1242_v42, %v456_v45  ;;  %v486_v27 = vsel %vm482_vm12, %v1245_v49, %v457_v31 }
  0xa5   : > { %v923_v30 = vpop.eup %922  ;;  %v565_v39 = vadd.f32 %v917_v14, %v536_v20  ;;  %v487_v1 = vsel %vm483_vm13, %v1255_v55, %v458_v22  ;;  %vm509_vm14 = vcmp.eq.f32.partialorder %v1382_v7, 3.0  ;;  %vm510_vm15 = vcmp.eq.f32.partialorder %v1386_v18, 3.0 }
  0xa6   : > { %v925_v50 = vpop.eup %924  ;;  %v566_v38 = vadd.f32 %v919_v28, %v537_v26  ;;  %v489_v42 = vsel %vm480_vm10, %v1364_v9, %v460_v32  ;;  %vm511_vm0 = vcmp.eq.f32.partialorder %v1390_v33, 3.0  ;;  %vm512_vm1 = vcmp.eq.f32.partialorder %v1394_v41, 3.0 }
  0xa7   : > { %v927_v44 = vpop.eup %926  ;;  %v592_v49 = vadd.f32 %v921_v40, %v563_v59  ;;  %v490_v52 = vsel %vm481_vm11, %v1364_v9, %v461_v2  ;;  %v491_v55 = vsel %vm482_vm12, %v1364_v9, %v462_v43  ;;  %v517_v58 = vstv %s1462_s7  ;;  %v1691_v43 = vld [vmem:[#allocation11_spill] sm:$0xff] }
  0xa8   : > { %v593_v36 = vadd.f32 %v923_v30, %v564_v25  ;;  %v492_v47 = vsel %vm483_vm13, %v1364_v9, %v463_v21  ;;  %v513_v53 = vsel %vm509_vm14, %v1252_v54, %v484_v34  ;;  %v514_v60 = vsel %vm510_vm15, %v1258_v56, %v485_v48  ;;  %v1692_v25 = vld [vmem:[#allocation13_spill] sm:$0xff]  ;;  %v1693_v34 = vld [vmem:[#allocation14_spill] sm:$0xff] }
  0xa9   : > { %v594_v61 = vadd.f32 %v925_v50, %v565_v39  ;;  %v515_v3 = vsel %vm511_vm0, %v1262_v63, %v486_v27  ;;  %v516_v13 = vsel %vm512_vm1, %v1271_v5, %v487_v1  ;;  %vm538_vm2 = vcmp.eq.f32.partialorder %v1382_v7, 4.0  ;;  %v1694_v27 = vld [vmem:[#allocation15_spill] sm:$0xff] }
  0xaa   : > { %v929_v62 = vpop.eup %928  ;;  %v595_v9 = vadd.f32 %v927_v44, %v566_v38  ;;  %v518_v54 = vsel %vm509_vm14, %v517_v58, %v489_v42  ;;  %v519_v56 = vsel %vm510_vm15, %v517_v58, %v490_v52  ;;  %vm539_vm3 = vcmp.eq.f32.partialorder %v1386_v18, 4.0 }
  0xab   : > { %v931_v16 = vpop.eup %930  ;;  %v621_v35 = vadd.f32 %v929_v62, %v592_v49  ;;  %v520_v63 = vsel %vm511_vm0, %v517_v58, %v491_v55  ;;  %v521_v5 = vsel %vm512_vm1, %v517_v58, %v492_v47  ;;  %vm540_vm4 = vcmp.eq.f32.partialorder %v1390_v33, 4.0 }
  0xac   : > { %v933_v45 = vpop.eup %932  ;;  %v622_v31 = vadd.f32 %v931_v16, %v593_v36  ;;  %vm541_vm5 = vcmp.eq.f32.partialorder %v1394_v41, 4.0  ;;  %v542_v24 = vsel %vm538_vm2, %v1268_v4, %v513_v53  ;;  %v543_v20 = vsel %vm539_vm3, %v1274_v6, %v514_v60  ;;  %v1690_v4 = vld [vmem:[#allocation12_spill] sm:$0xff] }
  0xad   : > { %v935_v19 = vpop.eup %934  ;;  %v623_v22 = vadd.f32 %v933_v45, %v594_v61  ;;  %936 = vlog2.f32 %v621_v35  ;;  %v546_v14 = vstv %s1499_s8  ;;  %v544_v28 = vsel %vm540_vm4, %v1278_v10, %v515_v3 }
  0xae   : > { %v624_v26 = vadd.f32 %v935_v19, %v595_v9  ;;  %938 = vlog2.f32 %v622_v31  ;;  %vm567_vm6 = vcmp.eq.f32.partialorder %v1382_v7, 5.0  ;;  %vm568_vm7 = vcmp.eq.f32.partialorder %v1386_v18, 5.0 }
  0xaf   : > { %940 = vlog2.f32 %v623_v22  ;;  %v545_v32 = vsel %vm541_vm5, %v1690_v4, %v516_v13  ;;  %vm569_vm8 = vcmp.eq.f32.partialorder %v1390_v33, 5.0  ;;  %vm570_vm9 = vcmp.eq.f32.partialorder %v1394_v41, 5.0 }
  0xb0   : > { %942 = vlog2.f32 %v624_v26  ;;  %v547_v6 = vsel %vm538_vm2, %v546_v14, %v518_v54  ;;  %v548_v10 = vsel %vm539_vm3, %v546_v14, %v519_v56  ;;  %v575_v59 = vstv %s1518_s9 }
  0xb1   : > { %v549_v40 = vsel %vm540_vm4, %v546_v14, %v520_v63  ;;  %v550_v2 = vsel %vm541_vm5, %v546_v14, %v521_v5  ;;  %v571_v21 = vsel %vm567_vm6, %v1691_v43, %v542_v24  ;;  %v572_v30 = vsel %vm568_vm7, %v1692_v25, %v543_v20 }
  0xb2   : > { %v573_v48 = vsel %vm569_vm8, %v1693_v34, %v544_v28  ;;  %v574_v39 = vsel %vm570_vm9, %v1694_v27, %v545_v32  ;;  %vm596_vm10 = vcmp.eq.f32.partialorder %v1382_v7, 6.0  ;;  %vm597_vm11 = vcmp.eq.f32.partialorder %v1386_v18, 6.0 }
  0xb3   : > { %v576_v50 = vsel %vm567_vm6, %v575_v59, %v547_v6  ;;  %vm598_vm12 = vcmp.eq.f32.partialorder %v1390_v33, 6.0  ;;  %vm599_vm13 = vcmp.eq.f32.partialorder %v1394_v41, 6.0  ;;  %v604_v1 = vstv %s1541_s28 }
  0xb4   : > { %v577_v38 = vsel %vm568_vm7, %v575_v59, %v548_v10  ;;  %v578_v44 = vsel %vm569_vm8, %v575_v59, %v549_v40  ;;  %v579_v42 = vsel %vm570_vm9, %v575_v59, %v550_v2  ;;  %v600_v49 = vsel %vm596_vm10, %v1303_v46, %v571_v21 }
  0xb5   : > { %v601_v52 = vsel %vm597_vm11, %v1307_v51, %v572_v30  ;;  %vm625_vm14 = vcmp.eq.f32.partialorder %v1382_v7, 7.0  ;;  %v602_v58 = vsel %vm598_vm12, %v1310_v57, %v573_v48  ;;  %v603_v36 = vsel %vm599_vm13, %v1323_v11, %v574_v39 }
  0xb6   : > { %v605_v47 = vsel %vm596_vm10, %v604_v1, %v576_v50  ;;  %vm626_vm15 = vcmp.eq.f32.partialorder %v1386_v18, 7.0  ;;  %v606_v46 = vsel %vm597_vm11, %v604_v1, %v577_v38  ;;  %vm627_vm0 = vcmp.eq.f32.partialorder %v1390_v33, 7.0 }
  0xb7   : > { %v937_v55 = vpop.eup %936  ;;  %v633_v51 = vstv %s1561_s10  ;;  %v607_v62 = vsel %vm598_vm12, %v604_v1, %v578_v44  ;;  %vm628_vm1 = vcmp.eq.f32.partialorder %v1394_v41, 7.0  ;;  %v629_v57 = vsel %vm625_vm14, %v1315_v0, %v600_v49 }
  0xb8   : > { %v939_v53 = vpop.eup %938  ;;  %v639_v60 = vmul.f32 0.6931472, %v937_v55  ;;  %v608_v13 = vsel %vm599_vm13, %v604_v1, %v579_v42  ;;  %v630_v9 = vsel %vm626_vm15, %v1320_v8, %v601_v52  ;;  %v631_v56 = vsel %vm627_vm0, %v1326_v12, %v602_v58 }
  0xb9   : > { %v941_v61 = vpop.eup %940  ;;  %v641_v11 = vmul.f32 0.6931472, %v939_v53  ;;  %v634_v35 = vsel %vm625_vm14, %v633_v51, %v605_v47  ;;  %v632_v63 = vsel %vm628_vm1, %v1339_v29, %v603_v36  ;;  %v635_v8 = vsel %vm626_vm15, %v633_v51, %v606_v46 }
  0xba   : > { %v943_v3 = vpop.eup %942  ;;  %v643_v16 = vmul.f32 0.6931472, %v941_v61  ;;  %v646_v54 = vadd.f32 %v639_v60, %v1329_v15  ;;  %v636_v31 = vsel %vm627_vm0, %v633_v51, %v607_v62  ;;  %v637_v19 = vsel %vm628_vm1, %v633_v51, %v608_v13 }
  0xbb   : > { %v645_v0 = vmul.f32 0.6931472, %v943_v3  ;;  %v647_v45 = vadd.f32 %v641_v11, %v1332_v17  ;;  %vm671_vm2 = vcmask 0  }
  0xbc   : > { %v648_v5 = vadd.f32 %v643_v16, %v1336_v23  ;;  %v650_v15 = vsub.f32 %v646_v54, %v629_v57 }
  0xbd   : > { %v649_v12 = vadd.f32 %v645_v0, %v1346_v37  ;;  %v651_v7 = vsub.f32 %v647_v45, %v630_v9 }
  0xbe   : > { %v652_v17 = vsub.f32 %v648_v5, %v631_v56  ;;  %v654_v24 = vmul.f32 %v650_v15, %v634_v35 }
  0xbf   : > { %v653_v22 = vsub.f32 %v649_v12, %v632_v63  ;;  %v655_v29 = vmul.f32 %v651_v7, %v635_v8 }
  0xc0   : > { %v656_v18 = vmul.f32 %v652_v17, %v636_v31 }
  0xc1   : > { %v657_v20 = vmul.f32 %v653_v22, %v637_v19  ;;  %v658_v14 = vadd.f32 %v655_v29, %v654_v24 }
  0xc3   : > { %v659_v23 = vadd.f32 %v658_v14, %v656_v18 }
  0xc5   : > { %v660_v26 = vadd.f32 %v659_v23, %v657_v20 }
  0xc7   : > { %661 = vadd.xlane.f32.xlu0 %v660_v26 }
 0x154   : > { %v662_v33 = vpop.xlane.xlu0 %661 }
 0x155   : > { %v663_v28 = vrot.slane %v662_v33, 4 }
 0x157   : > { %v664_v4 = vadd.f32 %v663_v28, %v662_v33 }
 0x159   : > { %v665_v37 = vrot.slane %v664_v4, 2 }
 0x15b   : > { %v666_v32 = vadd.f32 %v665_v37, %v664_v4 }
 0x15d   : > { %v667_v6 = vrot.slane %v666_v32, 1 }
 0x15f   : > { %v668_v41 = vadd.f32 %v667_v6, %v666_v32 }
 0x161   : > { %807 = vpush %v668_v41 }
 0x192   : > { %s808_s19 = spop %807 }
 0x193   : > { %v670_v10 = vstv %s808_s19 }
 0x194   : > { %672 = vst.msk [vmem:[%s211_s18] sm:$0x1] %vm671_vm2, %v670_v10 }
 0x195 PF: > { %p15_p11 = scmp.ge.s32.totalorder %s1094_s17, 4   ;;  %s1695_s12 = smov %s1036_s13 }
 0x196   : > { %s1696_s13 = smov %s1040_s14  ;;  %s1697_s14 = smov %s1104_s20 }
 0x197   : > { %s1698_s15 = smov %s1094_s17  ;;  %17 = sbr.rel (!%p15_p11) target bundleno = 5 (0x5), region = 89 }
 0x19e   :  { %690 = vsyncpa [#allocation3], 1 }
 0x19f   :  { %692 = vsyncpa [#allocation3 + $0x1], 1 }
 0x1a0   :  { %693 = vsyncpa [#allocation4], 1 }
 0x1a1   :  { %695 = vsyncpa [#allocation4 + $0x1], 1 }
 0x1a2   :  { %696 = vsyncpa [#allocation5], 1 }
 0x1a3   :  { %698 = vsyncpa [#allocation5 + $0x1], 1 }

</bundles_post_ra>
